<compile_context>
chip_gen: v7x
topology: tpu7x:2x2x1
jax: 0.10.0
libtpu: 0.0.40
codegen_flags: <defaults>
</compile_context>

<pallas_src>
import jax
import jax.numpy as jnp
from jax.experimental import pallas as pl
from jax.experimental.pallas import tpu as pltpu

INPUT_SIZE = 28 * 28       # 784
NUM_CLASSES = 10
MAX_TILE_B = 4096          # batch tile cap (multiple of 8); ~25 MiB double-buffered f32 x
VMEM_LIMIT_BYTES = 48 << 20


def _round_up(n, m):
    return ((n + m - 1) // m) * m


def _linear_kernel(x_ref, w_ref, b_ref, o_ref):
    # x_ref: (TILE_B, 784) f32    w_ref: (784, 10) bf16
    # b_ref: (1, 10) f32          o_ref: (TILE_B, 10) f32
    x = x_ref[...].astype(jnp.bfloat16)        # cast in-kernel; no extra HBM pass
    acc = jnp.dot(x, w_ref[...], preferred_element_type=jnp.float32)
    o_ref[...] = acc + b_ref[...]


def mnist_forward(x, w, b):
    """Forward pass of MnistModel.

    x: (B, 1, 28, 28) or (B, 28, 28) float32
    w: (784, 10) float32  (transposed vs PyTorch's (10, 784))
    b: (10,) float32
    returns: (B, 10) float32 logits
    """
    xb = x.reshape(-1, INPUT_SIZE)             # f32, no cast / no pad in the wrapper
    B = xb.shape[0]

    # Batch tile: multiple of 8, >= 2 grid steps when possible (v7x megacore),
    # capped so double-buffered f32 activations fit the scoped VMEM budget.
    tile_b = min(MAX_TILE_B, max(8, _round_up(pl.cdiv(B, 2), 8)))
    n_tiles = pl.cdiv(B, tile_b)               # ragged last block handled by Pallas

    w_bf16 = w.astype(jnp.bfloat16)            # tiny (784x10); one-time, VMEM-resident
    b_row = b.reshape(1, NUM_CLASSES).astype(jnp.float32)

    cost = pl.CostEstimate(
        flops=2 * B * INPUT_SIZE * NUM_CLASSES,
        transcendentals=0,
        bytes_accessed=(B * INPUT_SIZE * 4            # x (f32)
                        + INPUT_SIZE * NUM_CLASSES * 2  # w (bf16)
                        + NUM_CLASSES * 4               # bias (f32)
                        + B * NUM_CLASSES * 4),         # out (f32)
    )

    out = pl.pallas_call(
        _linear_kernel,
        out_shape=jax.ShapeDtypeStruct((B, NUM_CLASSES), jnp.float32),
        grid_spec=pltpu.PrefetchScalarGridSpec(
            num_scalar_prefetch=0,
            grid=(n_tiles,),
            in_specs=[
                # Activations: tiled along batch (double-buffered HBM->VMEM pipeline).
                pl.BlockSpec((tile_b, INPUT_SIZE), lambda i: (i, 0)),
                # Weight / bias: constant index map -> fetched once, stay resident.
                pl.BlockSpec((INPUT_SIZE, NUM_CLASSES), lambda i: (0, 0)),
                pl.BlockSpec((1, NUM_CLASSES), lambda i: (0, 0)),
            ],
            out_specs=pl.BlockSpec((tile_b, NUM_CLASSES), lambda i: (i, 0)),
        ),
        compiler_params=pltpu.CompilerParams(
            # Independent batch tiles -> shard across both TensorCores on v7x.
            dimension_semantics=("parallel",),
            vmem_limit_bytes=VMEM_LIMIT_BYTES,
        ),
        cost_estimate=cost,
    )(xb, w_bf16, b_row)

    return out


def init_params(key):
    # Deterministic init mimicking nn.Linear's U(-1/sqrt(fan_in), 1/sqrt(fan_in)).
    kw, kb = jax.random.split(key)
    bound = 1.0 / jnp.sqrt(jnp.float32(INPUT_SIZE))
    # PyTorch weight is (10, 784); we keep it transposed as (784, 10) for the matmul.
    w = jax.random.uniform(kw, (INPUT_SIZE, NUM_CLASSES), jnp.float32, -bound, bound)
    b = jax.random.uniform(kb, (NUM_CLASSES,), jnp.float32, -bound, bound)
    return w, b


if __name__ == "__main__":
    key = jax.random.PRNGKey(0)
    kx, kp = jax.random.split(key)

    B = 8
    x = jax.random.normal(kx, (B, 1, 28, 28), jnp.float32)  # NCHW like PyTorch MNIST
    w, b = init_params(kp)

    out = mnist_forward(x, w, b)
    out = jax.block_until_ready(out)

    # Reference with the same bf16-matmul / f32-accumulate recipe.
    xb_ref = x.reshape(-1, INPUT_SIZE).astype(jnp.bfloat16)
    ref = jnp.dot(xb_ref, w.astype(jnp.bfloat16),
                  preferred_element_type=jnp.float32) + b

    assert out.shape == (B, NUM_CLASSES)
    assert jnp.allclose(out, ref, atol=1e-2, rtol=1e-2), float(jnp.max(jnp.abs(out - ref)))

    print("KERNEL_OK")
</pallas_src>

<mosaic_0001>
module attributes {stable_mosaic.version = 11 : i64} {
  func.func @_linear_kernel(%arg0: i32, %arg1: memref<8x784xf32, #tpu.memory_space<vmem>>, %arg2: memref<784x10xbf16, #tpu.memory_space<vmem>>, %arg3: memref<1x10xf32, #tpu.memory_space<vmem>>, %arg4: memref<8x10xf32, #tpu.memory_space<vmem>>) attributes {dimension_semantics = [#tpu.dimension_semantics<parallel>], iteration_bounds = array<i64: 1>, scalar_prefetch = 0 : i64, scratch_operands = 0 : i64, tpu.core_type = #tpu.core_type<tc>, window_params = [{transform_indices = @transform_0, window_bounds = array<i64: 8, 784>}, {pipeline_mode = #tpu.pipeline_mode<synchronous>, transform_indices = @transform_1, window_bounds = array<i64: 784, 10>}, {pipeline_mode = #tpu.pipeline_mode<synchronous>, transform_indices = @transform_2, window_bounds = array<i64: 1, 10>}, {transform_indices = @transform_3, window_bounds = array<i64: 8, 10>}]} {
    %c0 = arith.constant 0 : index
    %c0_0 = arith.constant 0 : index
    %0 = vector.load %arg1[%c0, %c0_0] : memref<8x784xf32, #tpu.memory_space<vmem>>, vector<8x784xf32>
    %1 = arith.truncf %0 : vector<8x784xf32> to vector<8x784xbf16>
    %c0_1 = arith.constant 0 : index
    %c0_2 = arith.constant 0 : index
    %2 = vector.load %arg2[%c0_1, %c0_2] : memref<784x10xbf16, #tpu.memory_space<vmem>>, vector<784x10xbf16>
    %cst = arith.constant dense<0.000000e+00> : vector<8x10xf32>
    %3 = tpu.matmul %1, %2, %cst {dimension_numbers = #tpu.dot_dimension_numbers<[1], [0], [0], [1], [0, 0, 1, 1], [], []>} : vector<8x784xbf16>, vector<784x10xbf16>, vector<8x10xf32> -> vector<8x10xf32>
    %c0_3 = arith.constant 0 : index
    %c0_4 = arith.constant 0 : index
    %4 = vector.load %arg3[%c0_3, %c0_4] : memref<1x10xf32, #tpu.memory_space<vmem>>, vector<1x10xf32>
    %5 = vector.broadcast %4 : vector<1x10xf32> to vector<8x10xf32>
    %6 = arith.addf %3, %5 : vector<8x10xf32>
    %c0_5 = arith.constant 0 : index
    %c0_6 = arith.constant 0 : index
    %7 = vector.load %arg4[%c0_5, %c0_6] : memref<8x10xf32, #tpu.memory_space<vmem>>, vector<8x10xf32>
    tpu.vector_store %arg4[%c0_5, %c0_6], %6 {strides = array<i32>} : memref<8x10xf32, #tpu.memory_space<vmem>>, vector<8x10xf32>,
    return
  }
  func.func @transform_0(%arg0: i32) -> (i32, i32) {
    %c0_i32 = arith.constant 0 : i32
    %c0_i32_0 = arith.constant 0 : i32
    return %arg0, %c0_i32 : i32, i32
  }
  func.func @transform_1(%arg0: i32) -> (i32, i32) {
    %c0_i32 = arith.constant 0 : i32
    %c0_i32_0 = arith.constant 0 : i32
    %c0_i32_1 = arith.constant 0 : i32
    return %c0_i32, %c0_i32_0 : i32, i32
  }
  func.func @transform_2(%arg0: i32) -> (i32, i32) {
    %c0_i32 = arith.constant 0 : i32
    %c0_i32_0 = arith.constant 0 : i32
    %c0_i32_1 = arith.constant 0 : i32
    return %c0_i32, %c0_i32_0 : i32, i32
  }
  func.func @transform_3(%arg0: i32) -> (i32, i32) {
    %c0_i32 = arith.constant 0 : i32
    %c0_i32_0 = arith.constant 0 : i32
    return %arg0, %c0_i32 : i32, i32
  }
}

</mosaic_0001>

<bundles_post_ra>
// kernel: tpu_custom_call.1
= control target key start
LH: loop header
LB: loop body
LE: loop exit
PB: predicated region body
PF: predicated region fallthrough
CT: control target
= control target key end

     0   :  { %v810_v44 = vmov 0.0   ;;  %vm811_vm0 = vmmov 0   ;;  %s1016_s0 = inlined_call_operand.vmem [shape: f32[8,784], index: 0, kind: input, shape index: {}]   ;;  %s1017_s1 = inlined_call_operand.vmem [shape: bf16[784,10], index: 1, kind: input, shape index: {}]   ;;  %s1018_s2 = inlined_call_operand.vmem [shape: f32[1,10], index: 2, kind: input, shape index: {}]   ;;  %s1019_s3 = inlined_call_operand.hbm [shape: f32[8,10], index: 3, kind: output, shape index: {}]  }
   0x1   :  { %v737_v0 = vld [vmem:[%s1017_s1 + $0x40] sm:$0xff]   ;;  %v741_v4 = vld [vmem:[%s1017_s1 + $0x48] sm:$0xff]   ;;  %v745_v8 = vld [vmem:[%s1017_s1 + $0x50] sm:$0xff]  }
   0x2   :  { %v738_v1 = vld [vmem:[%s1017_s1] sm:$0xff]   ;;  %660 = vmatprep.subr.bf16.mxu0 %v737_v0  ;;  %v742_v5 = vld [vmem:[%s1017_s1 + $0x8] sm:$0xff]   ;;  %v746_v9 = vld [vmem:[%s1017_s1 + $0x10] sm:$0xff]  }
   0x3   :  { %v739_v2 = vld [vmem:[%s1017_s1 + $0xc0] sm:$0xff]   ;;  %661 = vmatpush3.bf16.msra.mxu0 %v738_v1  ;;  %v743_v6 = vld [vmem:[%s1017_s1 + $0xc8] sm:$0xff]   ;;  %v747_v10 = vld [vmem:[%s1017_s1 + $0xd0] sm:$0xff]  }
   0x4   :  { %v740_v3 = vld [vmem:[%s1017_s1 + $0x80] sm:$0xff]   ;;  %682 = vmatprep.subr.bf16.mxu1 %v739_v2  ;;  %662 = vmatprep.subr.bf16.mxu0 %v741_v4  ;;  %v744_v7 = vld [vmem:[%s1017_s1 + $0x88] sm:$0xff]   ;;  %v748_v11 = vld [vmem:[%s1017_s1 + $0x90] sm:$0xff]  }
   0x5   :  { %683 = vmatpush3.bf16.msra.mxu1 %v740_v3  ;;  %v749_v12 = vld [vmem:[%s1017_s1 + $0x58] sm:$0xff]   ;;  %v753_v16 = vld [vmem:[%s1017_s1 + $0x60] sm:$0xff]   ;;  %v757_v20 = vld [vmem:[%s1017_s1 + $0x68] sm:$0xff]  }
   0x6   :  { %684 = vmatprep.subr.bf16.mxu1 %v743_v6  ;;  %v750_v13 = vld [vmem:[%s1017_s1 + $0x18] sm:$0xff]   ;;  %v754_v17 = vld [vmem:[%s1017_s1 + $0x20] sm:$0xff]   ;;  %v758_v21 = vld [vmem:[%s1017_s1 + $0x28] sm:$0xff]  }
   0x7   :  { %663 = vmatpush3.bf16.msra.mxu0 %v742_v5  ;;  %v751_v14 = vld [vmem:[%s1017_s1 + $0xd8] sm:$0xff]   ;;  %v755_v18 = vld [vmem:[%s1017_s1 + $0xe0] sm:$0xff]   ;;  %v759_v22 = vld [vmem:[%s1017_s1 + $0xe8] sm:$0xff]  }
   0x8   :  { %664 = vmatprep.subr.bf16.mxu0 %v745_v8  ;;  %v752_v15 = vld [vmem:[%s1017_s1 + $0x98] sm:$0xff]   ;;  %v756_v19 = vld [vmem:[%s1017_s1 + $0xa0] sm:$0xff]   ;;  %v760_v23 = vld [vmem:[%s1017_s1 + $0xa8] sm:$0xff]  }
   0x9   :  { %685 = vmatpush3.bf16.msra.mxu1 %v744_v7  ;;  %v761_v24 = vld [vmem:[%s1017_s1 + $0x70] sm:$0xff]   ;;  %v765_v28 = vld [vmem:[%s1017_s1 + $0x78] sm:$0xff]   ;;  %v17_v31 = vld [vmem:[%s1016_s0 + $0x8] sm:$0xff] }
   0xa   :  { %686 = vmatprep.subr.bf16.mxu1 %v747_v10  ;;  %v762_v25 = vld [vmem:[%s1017_s1 + $0x30] sm:$0xff]   ;;  %v766_v29 = vld [vmem:[%s1017_s1 + $0x38] sm:$0xff]   ;;  %v24_v32 = vpack.c.bf16 %v17_v31, %v17_v31  ;;  %v16_v34 = vld [vmem:[%s1016_s0] sm:$0xff] }
   0xb   :  { %665 = vmatpush3.bf16.msra.mxu0 %v746_v9  ;;  %v763_v26 = vld [vmem:[%s1017_s1 + $0xf0] sm:$0xff]   ;;  %v767_v30 = vld [vmem:[%s1017_s1 + $0xf8] sm:$0xff]   ;;  %v23_v35 = vpack.c.bf16 %v16_v34, %v16_v34  ;;  %v769_v36 = vld [vmem:[%s1017_s1 + $0x140] sm:$0xff]  }
   0xc   :  { %666 = vmatprep.subr.bf16.mxu0 %v749_v12  ;;  %v764_v27 = vld [vmem:[%s1017_s1 + $0xb0] sm:$0xff]   ;;  %v768_v33 = vld [vmem:[%s1017_s1 + $0xb8] sm:$0xff]   ;;  %465 = vmatprep.mubr.bf16.mxu0 %v24_v32  ;;  %v770_v39 = vld [vmem:[%s1017_s1 + $0x100] sm:$0xff]  }
   0xd   :  { %687 = vmatpush3.bf16.msra.mxu1 %v748_v11  ;;  %v19_v37 = vld [vmem:[%s1016_s0 + $0x18] sm:$0xff]  ;;  %v18_v40 = vld [vmem:[%s1016_s0 + $0x10] sm:$0xff]  ;;  %v771_v42 = vld [vmem:[%s1017_s1 + $0x148] sm:$0xff]  }
   0xe   :  { %688 = vmatprep.subr.bf16.mxu1 %v751_v14  ;;  %v26_v38 = vpack.c.bf16 %v19_v37, %v19_v37  ;;  %v25_v41 = vpack.c.bf16 %v18_v40, %v18_v40  ;;  %v772_v43 = vld [vmem:[%s1017_s1 + $0x108] sm:$0xff]   ;;  %v773_v45 = vld [vmem:[%s1017_s1 + $0x150] sm:$0xff]   ;;  %v775_v47 = vld [vmem:[%s1017_s1 + $0x158] sm:$0xff]  }
   0xf   :  { %667 = vmatpush3.bf16.msra.mxu0 %v750_v13  ;;  %v774_v46 = vld [vmem:[%s1017_s1 + $0x110] sm:$0xff]   ;;  %v776_v48 = vld [vmem:[%s1017_s1 + $0x118] sm:$0xff]   ;;  %v777_v49 = vld [vmem:[%s1017_s1 + $0x160] sm:$0xff]  }
  0x10   :  { %668 = vmatprep.subr.bf16.mxu0 %v753_v16  ;;  %505 = vmatprep.mubr.bf16.mxu1 %v26_v38  ;;  %v778_v50 = vld [vmem:[%s1017_s1 + $0x120] sm:$0xff]   ;;  %v779_v51 = vld [vmem:[%s1017_s1 + $0x168] sm:$0xff]   ;;  %v22_v55 = vld [vmem:[%s1016_s0 + $0x30] sm:$0xff] }
  0x11   :  { %689 = vmatpush3.bf16.msra.mxu1 %v752_v15  ;;  %v785_v52 = vld [vmem:[%s1017_s1 + $0x180] sm:$0xff]   ;;  %v21_v53 = vld [vmem:[%s1016_s0 + $0x28] sm:$0xff] }
  0x12   :  { %690 = vmatprep.subr.bf16.mxu1 %v755_v18  ;;  %v28_v54 = vpack.c.bf16 %v21_v53, %v21_v53 }
  0x13   :  { %669 = vmatpush3.bf16.msra.mxu0 %v754_v17 }
  0x14   :  { %670 = vmatprep.subr.bf16.mxu0 %v757_v20 }
  0x15   :  { %691 = vmatpush3.bf16.msra.mxu1 %v756_v19 }
  0x16   :  { %692 = vmatprep.subr.bf16.mxu1 %v759_v22 }
  0x17   :  { %671 = vmatpush3.bf16.msra.mxu0 %v758_v21 }
  0x18   :  { %672 = vmatprep.subr.bf16.mxu0 %v761_v24 }
  0x19   :  { %693 = vmatpush3.bf16.msra.mxu1 %v760_v23 }
  0x1a   :  { %694 = vmatprep.subr.bf16.mxu1 %v763_v26 }
  0x1b   :  { %673 = vmatpush3.bf16.msra.mxu0 %v762_v25 }
  0x1c   :  { %674 = vmatprep.subr.bf16.mxu0 %v765_v28 }
  0x1d   :  { %695 = vmatpush3.bf16.msra.mxu1 %v764_v27 }
  0x1e   :  { %696 = vmatprep.subr.bf16.mxu1 %v767_v30 }
  0x1f   :  { %675 = vmatpush3.bf16.msra.mxu0 %v766_v29 }
  0x20   :  { %704 = vmatprep.subr.bf16.mxu0 %v769_v36 }
  0x21   :  { %697 = vmatpush3.bf16.msra.mxu1 %v768_v33 }
  0x22   :  { %466 = vmatmul.mubr.bf16.vlgmr.msra.gmra.mrb[0].mxu0 %v23_v35  ;;  %728 = vmatprep.subr.bf16.mxu1 %v810_v44 }
  0x23   :  { %705 = vmatpush3.bf16.msra.mxu0 %v770_v39 }
  0x24   :  { %506 = vmatmul.mubr.bf16.vlgmr.msra.gmra.mrb[0].mxu1 %v25_v41  ;;  %706 = vmatprep.subr.bf16.mxu0 %v771_v42 }
  0x25   :  { %730 = vmatprep.mubr.msk.bf16.mxu1 %vm811_vm0, %v810_v44 }
  0x27   :  { %707 = vmatpush3.bf16.msra.mxu0 %v772_v43 }
  0x28   :  { %708 = vmatprep.subr.bf16.mxu0 %v773_v45 }
  0x2b   :  { %709 = vmatpush3.bf16.msra.mxu0 %v774_v46 }
  0x2c   :  { %710 = vmatprep.subr.bf16.mxu0 %v775_v47 }
  0x2f   :  { %711 = vmatpush3.bf16.msra.mxu0 %v776_v48 }
  0x30   :  { %712 = vmatprep.subr.bf16.mxu0 %v777_v49 }
  0x31   :  { %8 = vsyncpa [#allocation3], 0  ;;  %v780_v56 = vld [vmem:[%s1017_s1 + $0x128] sm:$0xff]   ;;  %729 = vmatpush3.bf16.msra.mxu1 %v785_v52  ;;  %v29_v57 = vpack.c.bf16 %v22_v55, %v22_v55  ;;  %vm429_vm1 = vcmask 130048   ;;  %v781_v58 = vld [vmem:[%s1017_s1 + $0x170] sm:$0xff]   ;;  %545 = vmatprep.mubr.bf16.mxu0 %v28_v54  ;;  %vm593_vm2 = vcmask 80896  }
  0x32   :  { %v782_v59 = vld [vmem:[%s1017_s1 + $0x130] sm:$0xff]   ;;  %v783_v60 = vld [vmem:[%s1017_s1 + $0x178] sm:$0xff]   ;;  %v20_v62 = vld [vmem:[%s1016_s0 + $0x20] sm:$0xff]  ;;  %s812_s0 = smov [#allocation2]  }
  0x33   :  { %713 = vmatpush3.bf16.msra.mxu0 %v778_v50  ;;  %v784_v61 = vld [vmem:[%s1017_s1 + $0x138] sm:$0xff]   ;;  %v27_v63 = vpack.c.bf16 %v20_v62, %v20_v62  ;;  %v609_v1 = vld [vmem:[%s1018_s2] ss:$0 sm:$0xff]  ;;  %s601_s1 = sshll.u32 %s812_s0, 4  ;;  %s602_s1 = int_to_ptr.vmem [resolvable:$true] %s601_s1 }
  0x34   :  { %714 = vmatprep.subr.bf16.mxu0 %v779_v51  ;;  %731 = vmatmul.mubr.msk.bf16.vlgmr.msra.gmra.mrb[4].mxu1 %vm429_vm1, %v29_v57  ;;  %s786_s2 = scalar_lea.vmem %s602_s1, 128  ;;  %p791_p1 = scmp.lt.s32.totalorder %s602_s1, %s602_s1 }
  0x35   :  { %p787_p0 = scmp.ne.s32.totalorder %s602_s1, %s786_s2  ;;  %p792_p2 = scmp.lt.s32.totalorder %s786_s2, %s786_s2 }
  0x37   :  { %715 = vmatpush3.bf16.msra.mxu0 %v780_v56  ;;  %p793_p3 = por %p792_p2, %p791_p1 }
  0x38   :  { %716 = vmatprep.subr.bf16.mxu0 %v781_v58 }
  0x39   :  { %p794_p4 = pnand %p793_p3, %p787_p0 }
  0x3b   :  { %717 = vmatpush3.bf16.msra.mxu0 %v782_v59 }
  0x3c   :  { %718 = vmatprep.subr.bf16.mxu0 %v783_v60 }
  0x3f   :  { %719 = vmatpush3.bf16.msra.mxu0 %v784_v61 }
  0x42   :  { %546 = vmatmul.mubr.bf16.vlgmr.msra.gmra.mrb[4].mxu0 %v27_v63 }
  0xf5   :  { %v676_v0 = vpop.f32.mrb[0].mxu0 }
  0xf6   :  { %v677_v2 = vpop.f32.mrb[1].mxu0 }
  0xf7   :  { %v678_v3 = vadd.f32 %v677_v2, %v676_v0  ;;  %v679_v4 = vpop.f32.mrb[2].mxu0  ;;  %v698_v5 = vpop.f32.mrb[0].mxu1 }
  0xf8   :  { %v680_v6 = vpop.f32.mrb[3].mxu0  ;;  %v699_v8 = vpop.f32.mrb[1].mxu1 }
  0xf9   :  { %v468_v7 = vadd.f32 %v678_v3, %v609_v1  ;;  %v700_v9 = vadd.f32 %v699_v8, %v698_v5  ;;  %v701_v10 = vpop.f32.mrb[2].mxu1 }
  0xfa   :  { %v702_v11 = vpop.f32.mrb[3].mxu1 }
  0xfb   :  { %v508_v12 = vadd.f32 %v700_v9, %v468_v7 }
 0x107   :  { %v587_v13 = vpop.f32.mrb[4].mxu1 }
 0x108   :  { %v732_v14 = vpop.f32.mrb[5].mxu1 }
 0x109   :  { %v590_v15 = vpop.f32.mrb[6].mxu1 }
 0x10a   :  { %v733_v16 = vpop.f32.mrb[7].mxu1 }
 0x115   :  { %v720_v17 = vpop.f32.mrb[4].mxu0 }
 0x116   :  { %v721_v18 = vpop.f32.mrb[5].mxu0 }
 0x117   :  { %v722_v19 = vadd.f32 %v721_v18, %v720_v17  ;;  %v723_v20 = vpop.f32.mrb[6].mxu0 }
 0x118   :  { %v724_v21 = vpop.f32.mrb[7].mxu0 }
 0x119   :  { %v548_v22 = vadd.f32 %v722_v19, %v508_v12 }
 0x11b   :  { %v588_v23 = vadd.f32 %v587_v13, %v548_v22 }
 0x11d   :  { %594 = vst.msk [vmem:[#allocation2] sm:$0xff] %vm593_vm2, %v588_v23 }
 0x11e   :  { %797 = shalt.err (!%p794_p4)
}
 0x11f   :  { %s798_s20 = scalar_lea.hbm %s1019_s3, 128 }
 0x120   :  { %p799_p5 = scmp.ne.s32.totalorder %s1019_s3, %s798_s20  ;;  %p802_p6 = scmp.lt.u32.totalorder %s798_s20, %s1019_s3 }
 0x122   :  { %p804_p7 = pnand %p802_p6, %p799_p5 }
 0x124   :  { %807 = shalt.err (!%p804_p7)
}
 0x125   :  { %604 = dma.vmem_to_hbm [thread:$0]  %s602_s1, 128, %s1019_s3, [#allocation3]  }
 0x126   :  { %808 = dma.done.wait [#allocation3], 128  }
 0x127   :  { %809 = vsyncadd [#allocation3], 4294967168 }
 0x128   :  { %608 = vsyncpa [#allocation3], 1 }

</bundles_post_ra>
